<compile_context>
chip_gen: v6e
topology: v6e:2x2x1
jax: 0.10.0
libtpu: 0.0.40
codegen_flags: <defaults>
</compile_context>

<pallas_src>
import functools

import jax
import jax.numpy as jnp
from jax import lax
from jax.experimental import pallas as pl
from jax.experimental.pallas import tpu as pltpu

INPUT_VECTOR_SIZE = 14
HIDDEN1 = 32
HIDDEN2 = 32
ACTION_STEP = 1
ACTION_STEP_COUNT = 2 * ACTION_STEP + 1
OUTPUT_VECTOR_SIZE = ACTION_STEP_COUNT * ACTION_STEP_COUNT  # 9

_LANE = 128


def _round_up(n, m):
    return ((n + m - 1) // m) * m


def dqn_kernel(x_ref, w1_ref, b1_ref, w2_ref, b2_ref, w3_ref, b3_ref, o_ref):
    # x block arrives in its natural HBM layout (TB, 14) (batch on sublanes).
    # Layer 1 contracts the feature axis of both operands ('oi,bi->ob'), which puts the
    # batch tile on the 128-lane axis; h1/h2/out then stay batch-on-lanes so bias-add,
    # ReLU and the (9, TB) output store all run on full, unmasked vregs.
    x = x_ref[...]                                                       # (TB, 14)
    h1 = lax.dot_general(
        w1_ref[...], x,
        dimension_numbers=(((1,), (1,)), ((), ())),
        preferred_element_type=jnp.float32,
    )                                                                    # (32, TB)
    h1 = jnp.maximum(h1 + b1_ref[...], 0.0)
    h2 = jnp.dot(w2_ref[...], h1, preferred_element_type=jnp.float32)    # (32, TB)
    h2 = jnp.maximum(h2 + b2_ref[...], 0.0)
    o_ref[...] = (
        jnp.dot(w3_ref[...], h2, preferred_element_type=jnp.float32) + b3_ref[...]
    )                                                                    # (9, TB)


@functools.partial(jax.jit, static_argnames=("block_batch",))
def dqn_forward(x, params, *, block_batch=16384):
    """x: (B, 14) f32 -> (B, 9) f32, matching PyTorch DQN.forward."""
    w1, b1, w2, b2, w3, b3 = params
    B = x.shape[0]

    # Tiny batches only: pad up to one full 128-lane tile (<= 127 rows of copy) so the
    # single block never exceeds the array. For B >= 128 nothing is padded or copied.
    if B < _LANE:
        x = jnp.pad(x, ((0, _LANE - B), (0, 0)))
    Bp = x.shape[0]

    # Batch tile: lane-aligned, large enough to amortize the ~0.35us/step pipeline
    # overhead, small enough that the lane-padded (TB, 128) input block double-buffers
    # comfortably in VMEM, and >= 2 tiles whenever possible so the "parallel" batch
    # grid can be split across both TensorCores on v7x.
    TB = min(_round_up(block_batch, _LANE),
             max(_LANE, _round_up(pl.cdiv(Bp, 2), _LANE)))
    num_tiles = pl.cdiv(Bp, TB)  # ragged last block is fine: OOB stores are masked.

    resident = lambda i: (0, 0)  # weights / biases: same block every grid step.

    out = pl.pallas_call(
        dqn_kernel,
        out_shape=jax.ShapeDtypeStruct((OUTPUT_VECTOR_SIZE, Bp), jnp.float32),
        grid_spec=pltpu.PrefetchScalarGridSpec(
            num_scalar_prefetch=0,
            grid=(num_tiles,),
            in_specs=[
                pl.BlockSpec((TB, INPUT_VECTOR_SIZE), lambda i: (i, 0)),
                pl.BlockSpec((HIDDEN1, INPUT_VECTOR_SIZE), resident),
                pl.BlockSpec((HIDDEN1, 1), resident),
                pl.BlockSpec((HIDDEN2, HIDDEN1), resident),
                pl.BlockSpec((HIDDEN2, 1), resident),
                pl.BlockSpec((OUTPUT_VECTOR_SIZE, HIDDEN2), resident),
                pl.BlockSpec((OUTPUT_VECTOR_SIZE, 1), resident),
            ],
            out_specs=pl.BlockSpec((OUTPUT_VECTOR_SIZE, TB), lambda i: (0, i)),
        ),
        compiler_params=pltpu.CompilerParams(
            dimension_semantics=("parallel",),       # shard batch tiles across TCs (v7x)
            vmem_limit_bytes=48 * 1024 * 1024,       # headroom for TB=16384 double-buffers
        ),
    )(x, w1, b1, w2, b2, w3, b3)

    # Final layout fix-up only (9, B) -> (B, 9); the heavy x-side transpose is gone.
    return out[:, :B].T


def init_params(key):
    """PyTorch nn.Linear default init (U[-1/sqrt(fan_in), 1/sqrt(fan_in)]).

    Weights in PyTorch (out, in) layout; biases as (out, 1) so they broadcast along the
    lane (batch) axis inside the kernel.
    """

    def linear(key, fan_in, fan_out):
        k_w, k_b = jax.random.split(key)
        bound = 1.0 / jnp.sqrt(jnp.float32(fan_in))
        w = jax.random.uniform(k_w, (fan_out, fan_in), jnp.float32, -bound, bound)
        b = jax.random.uniform(k_b, (fan_out, 1), jnp.float32, -bound, bound)
        return w, b

    k1, k2, k3 = jax.random.split(key, 3)
    w1, b1 = linear(k1, INPUT_VECTOR_SIZE, HIDDEN1)
    w2, b2 = linear(k2, HIDDEN1, HIDDEN2)
    w3, b3 = linear(k3, HIDDEN2, OUTPUT_VECTOR_SIZE)
    return (w1, b1, w2, b2, w3, b3)


def reference_forward(x, params):
    w1, b1, w2, b2, w3, b3 = params
    h1 = jnp.maximum(x @ w1.T + b1.T, 0.0)
    h2 = jnp.maximum(h1 @ w2.T + b2.T, 0.0)
    return h2 @ w3.T + b3.T


if __name__ == "__main__":
    key = jax.random.PRNGKey(0)
    k_params, k_x = jax.random.split(key)
    params = init_params(k_params)

    # Small online-inference style batch (single tile, B < 128 pad path).
    B = 8
    x = jax.random.normal(k_x, (B, INPUT_VECTOR_SIZE), jnp.float32)
    out = jax.block_until_ready(dqn_forward(x, params))
    ref = reference_forward(x, params)
    assert out.shape == (B, OUTPUT_VECTOR_SIZE)
    assert jnp.allclose(out, ref, atol=1e-5, rtol=1e-5)

    # Multi-tile path with a ragged last block (B=300, TB=128 -> 3 tiles, last masked).
    B2 = 300
    x2 = jax.random.normal(jax.random.PRNGKey(1), (B2, INPUT_VECTOR_SIZE), jnp.float32)
    out2 = jax.block_until_ready(dqn_forward(x2, params, block_batch=128))
    ref2 = reference_forward(x2, params)
    assert out2.shape == (B2, OUTPUT_VECTOR_SIZE)
    assert jnp.allclose(out2, ref2, atol=1e-5, rtol=1e-5)

    # Default tile selection path (>=2 tiles heuristic, TB=256, ragged last block).
    out3 = jax.block_until_ready(dqn_forward(x2, params))
    assert out3.shape == (B2, OUTPUT_VECTOR_SIZE)
    assert jnp.allclose(out3, ref2, atol=1e-5, rtol=1e-5)

    print("KERNEL_OK")
</pallas_src>

<mosaic_0001>
module attributes {stable_mosaic.version = 11 : i64} {
  func.func @dqn_kernel(%arg0: i32, %arg1: memref<128x14xf32, #tpu.memory_space<vmem>>, %arg2: memref<32x14xf32, #tpu.memory_space<vmem>>, %arg3: memref<32x1xf32, #tpu.memory_space<vmem>>, %arg4: memref<32x32xf32, #tpu.memory_space<vmem>>, %arg5: memref<32x1xf32, #tpu.memory_space<vmem>>, %arg6: memref<9x32xf32, #tpu.memory_space<vmem>>, %arg7: memref<9x1xf32, #tpu.memory_space<vmem>>, %arg8: memref<9x128xf32, #tpu.memory_space<vmem>>) attributes {dimension_semantics = [#tpu.dimension_semantics<parallel>], iteration_bounds = array<i64: 1>, scalar_prefetch = 0 : i64, scratch_operands = 0 : i64, tpu.core_type = #tpu.core_type<tc>, window_params = [{transform_indices = @transform_0, window_bounds = array<i64: 128, 14>}, {pipeline_mode = #tpu.pipeline_mode<synchronous>, transform_indices = @transform_1, window_bounds = array<i64: 32, 14>}, {pipeline_mode = #tpu.pipeline_mode<synchronous>, transform_indices = @transform_2, window_bounds = array<i64: 32, 1>}, {pipeline_mode = #tpu.pipeline_mode<synchronous>, transform_indices = @transform_3, window_bounds = array<i64: 32, 32>}, {pipeline_mode = #tpu.pipeline_mode<synchronous>, transform_indices = @transform_4, window_bounds = array<i64: 32, 1>}, {pipeline_mode = #tpu.pipeline_mode<synchronous>, transform_indices = @transform_5, window_bounds = array<i64: 9, 32>}, {pipeline_mode = #tpu.pipeline_mode<synchronous>, transform_indices = @transform_6, window_bounds = array<i64: 9, 1>}, {transform_indices = @transform_7, window_bounds = array<i64: 9, 128>}]} {
    %c0 = arith.constant 0 : index
    %c0_0 = arith.constant 0 : index
    %0 = vector.load %arg1[%c0, %c0_0] : memref<128x14xf32, #tpu.memory_space<vmem>>, vector<128x14xf32>
    %c0_1 = arith.constant 0 : index
    %c0_2 = arith.constant 0 : index
    %1 = vector.load %arg2[%c0_1, %c0_2] : memref<32x14xf32, #tpu.memory_space<vmem>>, vector<32x14xf32>
    %cst = arith.constant dense<0.000000e+00> : vector<32x128xf32>
    %2 = tpu.matmul %1, %0, %cst {dimension_numbers = #tpu.dot_dimension_numbers<[1], [1], [0], [0], [0, 0, 1, 0], [], []>} : vector<32x14xf32>, vector<128x14xf32>, vector<32x128xf32> -> vector<32x128xf32>
    %c0_3 = arith.constant 0 : index
    %c0_4 = arith.constant 0 : index
    %3 = vector.load %arg3[%c0_3, %c0_4] : memref<32x1xf32, #tpu.memory_space<vmem>>, vector<32x1xf32>
    %4 = vector.broadcast %3 : vector<32x1xf32> to vector<32x128xf32>
    %5 = arith.addf %2, %4 : vector<32x128xf32>
    %cst_5 = arith.constant 0.000000e+00 : f32
    %6 = vector.broadcast %cst_5 : f32 to vector<32x128xf32>
    %7 = arith.maximumf %5, %6 : vector<32x128xf32>
    %c0_6 = arith.constant 0 : index
    %c0_7 = arith.constant 0 : index
    %8 = vector.load %arg4[%c0_6, %c0_7] : memref<32x32xf32, #tpu.memory_space<vmem>>, vector<32x32xf32>
    %cst_8 = arith.constant dense<0.000000e+00> : vector<32x128xf32>
    %9 = tpu.matmul %8, %7, %cst_8 {dimension_numbers = #tpu.dot_dimension_numbers<[1], [0], [0], [1], [0, 0, 1, 1], [], []>} : vector<32x32xf32>, vector<32x128xf32>, vector<32x128xf32> -> vector<32x128xf32>
    %c0_9 = arith.constant 0 : index
    %c0_10 = arith.constant 0 : index
    %10 = vector.load %arg5[%c0_9, %c0_10] : memref<32x1xf32, #tpu.memory_space<vmem>>, vector<32x1xf32>
    %11 = vector.broadcast %10 : vector<32x1xf32> to vector<32x128xf32>
    %12 = arith.addf %9, %11 : vector<32x128xf32>
    %cst_11 = arith.constant 0.000000e+00 : f32
    %13 = vector.broadcast %cst_11 : f32 to vector<32x128xf32>
    %14 = arith.maximumf %12, %13 : vector<32x128xf32>
    %c0_12 = arith.constant 0 : index
    %c0_13 = arith.constant 0 : index
    %15 = vector.load %arg6[%c0_12, %c0_13] : memref<9x32xf32, #tpu.memory_space<vmem>>, vector<9x32xf32>
    %cst_14 = arith.constant dense<0.000000e+00> : vector<9x128xf32>
    %16 = tpu.matmul %15, %14, %cst_14 {dimension_numbers = #tpu.dot_dimension_numbers<[1], [0], [0], [1], [0, 0, 1, 1], [], []>} : vector<9x32xf32>, vector<32x128xf32>, vector<9x128xf32> -> vector<9x128xf32>
    %c0_15 = arith.constant 0 : index
    %c0_16 = arith.constant 0 : index
    %17 = vector.load %arg7[%c0_15, %c0_16] : memref<9x1xf32, #tpu.memory_space<vmem>>, vector<9x1xf32>
    %18 = vector.broadcast %17 : vector<9x1xf32> to vector<9x128xf32>
    %19 = arith.addf %16, %18 : vector<9x128xf32>
    %c0_17 = arith.constant 0 : index
    %c0_18 = arith.constant 0 : index
    %20 = vector.load %arg8[%c0_17, %c0_18] : memref<9x128xf32, #tpu.memory_space<vmem>>, vector<9x128xf32>
    tpu.vector_store %arg8[%c0_17, %c0_18], %19 {strides = array<i32>} : memref<9x128xf32, #tpu.memory_space<vmem>>, vector<9x128xf32>,
    return
  }
  func.func @transform_0(%arg0: i32) -> (i32, i32) {
    %c0_i32 = arith.constant 0 : i32
    %c0_i32_0 = arith.constant 0 : i32
    return %arg0, %c0_i32 : i32, i32
  }
  func.func @transform_1(%arg0: i32) -> (i32, i32) {
    %c0_i32 = arith.constant 0 : i32
    %c0_i32_0 = arith.constant 0 : i32
    %c0_i32_1 = arith.constant 0 : i32
    return %c0_i32, %c0_i32_0 : i32, i32
  }
  func.func @transform_2(%arg0: i32) -> (i32, i32) {
    %c0_i32 = arith.constant 0 : i32
    %c0_i32_0 = arith.constant 0 : i32
    %c0_i32_1 = arith.constant 0 : i32
    return %c0_i32, %c0_i32_0 : i32, i32
  }
  func.func @transform_3(%arg0: i32) -> (i32, i32) {
    %c0_i32 = arith.constant 0 : i32
    %c0_i32_0 = arith.constant 0 : i32
    %c0_i32_1 = arith.constant 0 : i32
    return %c0_i32, %c0_i32_0 : i32, i32
  }
  func.func @transform_4(%arg0: i32) -> (i32, i32) {
    %c0_i32 = arith.constant 0 : i32
    %c0_i32_0 = arith.constant 0 : i32
    %c0_i32_1 = arith.constant 0 : i32
    return %c0_i32, %c0_i32_0 : i32, i32
  }
  func.func @transform_5(%arg0: i32) -> (i32, i32) {
    %c0_i32 = arith.constant 0 : i32
    %c0_i32_0 = arith.constant 0 : i32
    %c0_i32_1 = arith.constant 0 : i32
    return %c0_i32, %c0_i32_0 : i32, i32
  }
  func.func @transform_6(%arg0: i32) -> (i32, i32) {
    %c0_i32 = arith.constant 0 : i32
    %c0_i32_0 = arith.constant 0 : i32
    %c0_i32_1 = arith.constant 0 : i32
    return %c0_i32, %c0_i32_0 : i32, i32
  }
  func.func @transform_7(%arg0: i32) -> (i32, i32) {
    %c0_i32 = arith.constant 0 : i32
    %c0_i32_0 = arith.constant 0 : i32
    return %c0_i32, %arg0 : i32, i32
  }
}

</mosaic_0001>

<bundles_post_ra>
// kernel: dqn_forward.1
= control target key start
LH: loop header
LB: loop body
LE: loop exit
PB: predicated region body
PF: predicated region fallthrough
CT: control target
= control target key end

     0   :  { %vm70_vm0 = vcmask 113664   ;;  %v577_v2 = vmov 0   ;;  %vm248_vm1 = vcmask 261120   ;;  %s774_s0 = inlined_call_operand.vmem [shape: f32[128,14], index: 0, kind: input, shape index: {}]   ;;  %s775_s1 = inlined_call_operand.vmem [shape: f32[32,14], index: 1, kind: input, shape index: {}]   ;;  %s776_s2 = inlined_call_operand.vmem [shape: f32[32,1], index: 2, kind: input, shape index: {}]   ;;  %s777_s4 = inlined_call_operand.vmem [shape: f32[32,1], index: 4, kind: input, shape index: {}]   ;;  %s778_s6 = inlined_call_operand.vmem [shape: f32[9,1], index: 6, kind: input, shape index: {}]   ;;  %s779_s3 = inlined_call_operand.vmem [shape: f32[32,32], index: 3, kind: input, shape index: {}]   ;;  %s780_s5 = inlined_call_operand.vmem [shape: f32[9,32], index: 5, kind: input, shape index: {}]   ;;  %s781_s7 = inlined_call_operand.vmem [shape: f32[9,128], index: 7, kind: output, shape index: {}]  }
   0x1   :  { %v41_v0 = vld [vmem:[%s774_s0 + $0x78] sm:$0xff]  ;;  %v40_v1 = vld [vmem:[%s774_s0 + $0x70] sm:$0xff]  ;;  %575 = vset.pattern.permute.xlu0 %v577_v2  ;;  %576 = vset.pattern.permute.xlu1 %v577_v2  ;;  %v39_v3 = vld [vmem:[%s774_s0 + $0x68] sm:$0xff] }
   0x2   :  { %511 = vmatprep.subr.msk.mxu0 %vm70_vm0, %v41_v0  ;;  %v42_v4 = vld [vmem:[%s775_s1] sm:$0xff]  ;;  %v49_v5 = vld [vmem:[%s776_s2 + $0x18] sm:$0xff]  ;;  %v47_v6 = vld [vmem:[%s776_s2 + $0x8] sm:$0xff] }
   0x3   :  { %512 = vmatpush3.xpose.msk.msra.mxu0 %vm70_vm0, %v41_v0  ;;  %543 = vmatprep.mubr.msk.f32.mxu0 %vm70_vm0, %v42_v4  ;;  %v38_v7 = vld [vmem:[%s774_s0 + $0x60] sm:$0xff]  ;;  %v48_v8 = vld [vmem:[%s776_s2 + $0x10] sm:$0xff]  ;;  %v37_v10 = vld [vmem:[%s774_s0 + $0x58] sm:$0xff] }
   0x4   :  { %513 = vmatprep.subr.msk.mxu0 %vm70_vm0, %v40_v1  ;;  %67 = vperm.xlu0 %575, %v49_v5   ;;  %v46_v9 = vld [vmem:[%s776_s2] sm:$0xff]  ;;  %v227_v11 = vld [vmem:[%s777_s4 + $0x18] sm:$0xff]  ;;  %v226_v12 = vld [vmem:[%s777_s4 + $0x10] sm:$0xff] }
   0x5   :  { %57 = vperm.xlu1 %576, %v47_v6   ;;  %v36_v13 = vld [vmem:[%s774_s0 + $0x50] sm:$0xff]  ;;  %v225_v14 = vld [vmem:[%s777_s4 + $0x8] sm:$0xff]  ;;  %v224_v15 = vld [vmem:[%s777_s4] sm:$0xff] }
   0x6   :  { %v35_v16 = vld [vmem:[%s774_s0 + $0x48] sm:$0xff]  ;;  %v352_v17 = vld [vmem:[%s778_s6] sm:$0xff]  ;;  %v33_v20 = vld [vmem:[%s774_s0 + $0x38] sm:$0xff] }
   0x7   :  { %514 = vmatpush3.xpose.msk.msra.mxu0 %vm70_vm0, %v40_v1  ;;  %v353_v18 = vld [vmem:[%s778_s6 + $0x8] sm:$0x1]  ;;  %v34_v19 = vld [vmem:[%s774_s0 + $0x40] sm:$0xff]  ;;  %v32_v21 = vld [vmem:[%s774_s0 + $0x30] sm:$0xff] }
   0x8   :  { %515 = vmatprep.subr.msk.mxu0 %vm70_vm0, %v39_v3  ;;  %62 = vperm.xlu0 %575, %v48_v8   ;;  %v31_v22 = vld [vmem:[%s774_s0 + $0x28] sm:$0xff]  ;;  %v30_v23 = vld [vmem:[%s774_s0 + $0x20] sm:$0xff]  ;;  %v29_v24 = vld [vmem:[%s774_s0 + $0x18] sm:$0xff] }
   0x9   :  { %52 = vperm.xlu1 %576, %v46_v9   ;;  %v28_v25 = vld [vmem:[%s774_s0 + $0x10] sm:$0xff]  ;;  %v27_v26 = vld [vmem:[%s774_s0 + $0x8] sm:$0xff]  ;;  %v26_v27 = vld [vmem:[%s774_s0] sm:$0xff] }
   0xa   :  { %v43_v28 = vld [vmem:[%s775_s1 + $0x8] sm:$0xff]  ;;  %v44_v29 = vld [vmem:[%s775_s1 + $0x10] sm:$0xff]  ;;  %v45_v30 = vld [vmem:[%s775_s1 + $0x18] sm:$0xff] }
   0xb   :  { %516 = vmatpush3.xpose.msk.msra.mxu0 %vm70_vm0, %v39_v3  ;;  %v220_v31 = vld [vmem:[%s779_s3] sm:$0xff]  ;;  %v221_v48 = vld [vmem:[%s779_s3 + $0x8] sm:$0xff]  ;;  %v222_v49 = vld [vmem:[%s779_s3 + $0x10] sm:$0xff] }
   0xc   :  { %517 = vmatprep.subr.msk.mxu0 %vm70_vm0, %v38_v7  ;;  %245 = vperm.xlu0 %575, %v227_v11   ;;  %v223_v50 = vld [vmem:[%s779_s3 + $0x18] sm:$0xff]  ;;  %v350_v51 = vld [vmem:[%s780_s5] sm:$0xff]  ;;  %v351_v4 = vld [vmem:[%s780_s5 + $0x8] sm:$0x1] }
   0xd   :  { %240 = vperm.xlu1 %576, %v226_v12   ;;  %557 = vmatprep.mubr.msk.f32.mxu1 %vm248_vm1, %v220_v31 }
   0xf   :  { %518 = vmatpush3.xpose.msk.msra.mxu0 %vm70_vm0, %v38_v7 }
  0x10   :  { %519 = vmatprep.subr.msk.mxu0 %vm70_vm0, %v37_v10  ;;  %235 = vperm.xlu0 %575, %v225_v14  }
  0x11   :  { %230 = vperm.xlu1 %576, %v224_v15  }
  0x13   :  { %520 = vmatpush3.xpose.msk.msra.mxu0 %vm70_vm0, %v37_v10 }
  0x14   :  { %521 = vmatprep.subr.msk.mxu0 %vm70_vm0, %v36_v13  ;;  %356 = vperm.xlu0 %575, %v352_v17  }
  0x15   :  { %361 = vperm.xlu1 %576, %v353_v18  }
  0x17   :  { %522 = vmatpush3.xpose.msk.msra.mxu0 %vm70_vm0, %v36_v13 }
  0x18   :  { %523 = vmatprep.subr.msk.mxu0 %vm70_vm0, %v35_v16 }
  0x1b   :  { %524 = vmatpush3.xpose.msk.msra.mxu0 %vm70_vm0, %v35_v16 }
  0x1c   :  { %525 = vmatprep.subr.msk.mxu0 %vm70_vm0, %v34_v19 }
  0x1f   :  { %526 = vmatpush3.xpose.msk.msra.mxu0 %vm70_vm0, %v34_v19 }
  0x20   :  { %527 = vmatprep.subr.msk.mxu0 %vm70_vm0, %v33_v20 }
  0x23   :  { %528 = vmatpush3.xpose.msk.msra.mxu0 %vm70_vm0, %v33_v20 }
  0x24   :  { %529 = vmatprep.subr.msk.mxu0 %vm70_vm0, %v32_v21 }
  0x27   :  { %530 = vmatpush3.xpose.msk.msra.mxu0 %vm70_vm0, %v32_v21 }
  0x28   :  { %531 = vmatprep.subr.msk.mxu0 %vm70_vm0, %v31_v22 }
  0x2b   :  { %532 = vmatpush3.xpose.msk.msra.mxu0 %vm70_vm0, %v31_v22 }
  0x2c   :  { %533 = vmatprep.subr.msk.mxu0 %vm70_vm0, %v30_v23 }
  0x2f   :  { %534 = vmatpush3.xpose.msk.msra.mxu0 %vm70_vm0, %v30_v23 }
  0x30   :  { %535 = vmatprep.subr.msk.mxu0 %vm70_vm0, %v29_v24 }
  0x33   :  { %536 = vmatpush3.xpose.msk.msra.mxu0 %vm70_vm0, %v29_v24 }
  0x34   :  { %537 = vmatprep.subr.msk.mxu0 %vm70_vm0, %v28_v25 }
  0x37   :  { %538 = vmatpush3.xpose.msk.msra.mxu0 %vm70_vm0, %v28_v25 }
  0x38   :  { %539 = vmatprep.subr.msk.mxu0 %vm70_vm0, %v27_v26 }
  0x3b   :  { %540 = vmatpush3.xpose.msk.msra.mxu0 %vm70_vm0, %v27_v26 }
  0x3c   :  { %541 = vmatprep.subr.msk.mxu0 %vm70_vm0, %v26_v27 }
  0x3f   :  { %542 = vmatpush3.xpose.msk.msra.mxu0 %vm70_vm0, %v26_v27 }
  0x42   :  { %544 = vmatmul.mubr.msk.f32.vlgmr.msra.gmra.mxu0 %vm70_vm0, %v43_v28 }
  0x43   :  { %546 = vmatprep.mubr.msk.f32.mxu0 %vm70_vm0, %v44_v29 }
  0x46   :  { %547 = vmatmul.mubr.msk.f32.gmra.mxu0 %vm70_vm0, %v45_v30 }
  0x7f   :  { %v68_v32 = vpop.permute.xlu0 %67 }
  0x80   :  { %v58_v34 = vpop.permute.xlu1 %57 }
  0x83   :  { %v63_v38 = vpop.permute.xlu0 %62 }
  0x84   :  { %v53_v43 = vpop.permute.xlu1 %52 }
  0x87   :  { %v246_v52 = vpop.permute.xlu0 %245 }
  0x88   :  { %v241_v54 = vpop.permute.xlu1 %240 }
  0x8b   :  { %v236_v58 = vpop.permute.xlu0 %235 }
  0x8c   :  { %v231_v63 = vpop.permute.xlu1 %230 }
  0x8f   :  { %v357_v8 = vpop.permute.xlu0 %356 }
  0x90   :  { %v362_v5 = vpop.permute.xlu1 %361 }
 0x102   :  { %v545_v33 = vpop.f32.mrf.mxu0 }
 0x103   :  { %v203_v40 = vadd.f32 %v545_v33, %v58_v34 }
 0x104   :  { %v197_v35 = vpop.f32.mrf.mxu0 }
 0x105   :  { %v198_v44 = vadd.f32 %v197_v35, %v53_v43  ;;  %v217_v46 = vmax.f32 %v203_v40, 0.0 }
 0x106   :  { %v548_v36 = vpop.f32.mrf.mxu0 }
 0x107   :  { %v213_v37 = vadd.f32 %v548_v36, %v68_v32  ;;  %v216_v47 = vmax.f32 %v198_v44, 0.0 }
 0x108   :  { %v207_v39 = vpop.f32.mrf.mxu0 }
 0x109   :  { %v219_v41 = vmax.f32 %v213_v37, 0.0  ;;  %v208_v42 = vadd.f32 %v207_v39, %v63_v38 }
 0x10b   :  { %v218_v45 = vmax.f32 %v208_v42, 0.0  ;;  %549 = vmatprep.subr.mxu1 %v219_v41 }
 0x10c   :  { %550 = vmatpush3.msra.mxu1 %v219_v41 }
 0x10d   :  { %551 = vmatprep.subr.mxu1 %v218_v45 }
 0x10e   :  { %552 = vmatpush3.msra.mxu1 %v218_v45 }
 0x10f   :  { %553 = vmatprep.subr.mxu1 %v217_v46 }
 0x110   :  { %554 = vmatpush3.msra.mxu1 %v217_v46 }
 0x111   :  { %555 = vmatprep.subr.mxu1 %v216_v47 }
 0x112   :  { %556 = vmatpush3.msra.mxu1 %v216_v47 }
 0x113   :  { %558 = vmatmul.mubr.msk.f32.vlgmr.msra.gmra.mxu1 %vm248_vm1, %v221_v48 }
 0x114   :  { %560 = vmatprep.mubr.msk.f32.mxu1 %vm248_vm1, %v222_v49 }
 0x117   :  { %561 = vmatmul.mubr.msk.f32.gmra.mxu1 %vm248_vm1, %v223_v50 }
 0x118   :  { %571 = vmatprep.mubr.msk.f32.mxu1 %vm248_vm1, %v350_v51 }
 0x1d3   :  { %v559_v53 = vpop.f32.mrf.mxu1 }
 0x1d4   :  { %v333_v60 = vadd.f32 %v559_v53, %v236_v58 }
 0x1d5   :  { %v327_v55 = vpop.f32.mrf.mxu1 }
 0x1d6   :  { %v328_v0 = vadd.f32 %v327_v55, %v231_v63  ;;  %v347_v2 = vmax.f32 %v333_v60, 0.0 }
 0x1d7   :  { %v562_v56 = vpop.f32.mrf.mxu1 }
 0x1d8   :  { %v343_v57 = vadd.f32 %v562_v56, %v246_v52  ;;  %v346_v3 = vmax.f32 %v328_v0, 0.0 }
 0x1d9   :  { %v337_v59 = vpop.f32.mrf.mxu1 }
 0x1da   :  { %v349_v61 = vmax.f32 %v343_v57, 0.0  ;;  %v338_v62 = vadd.f32 %v337_v59, %v241_v54 }
 0x1dc   :  { %v348_v1 = vmax.f32 %v338_v62, 0.0  ;;  %563 = vmatprep.subr.mxu1 %v349_v61 }
 0x1dd   :  { %564 = vmatpush3.msra.mxu1 %v349_v61 }
 0x1de   :  { %565 = vmatprep.subr.mxu1 %v348_v1 }
 0x1df   :  { %566 = vmatpush3.msra.mxu1 %v348_v1 }
 0x1e0   :  { %567 = vmatprep.subr.mxu1 %v347_v2 }
 0x1e1   :  { %568 = vmatpush3.msra.mxu1 %v347_v2 }
 0x1e2   :  { %569 = vmatprep.subr.mxu1 %v346_v3 }
 0x1e3   :  { %570 = vmatpush3.msra.mxu1 %v346_v3 }
 0x1e4   :  { %572 = vmatmul.mubr.msk.f32.vlgmr.msra.gmra.mxu1 %vm248_vm1, %v351_v4 }
 0x2a4   :  { %v573_v6 = vpop.f32.mrf.mxu1 }
 0x2a5   :  { %v442_v7 = vadd.f32 %v573_v6, %v362_v5 }
 0x2a6   :  { %v436_v9 = vpop.f32.mrf.mxu1 }
 0x2a7   :  { %446 = vst [vmem:[%s781_s7 + $0x8] sm:$0x1] %v442_v7  ;;  %v437_v10 = vadd.f32 %v436_v9, %v357_v8 }
 0x2a9   :  { %445 = vst [vmem:[%s781_s7] sm:$0xff] %v437_v10 }

</bundles_post_ra>
